<compile_context>
chip_gen: v5e
topology: v5e:2x2
jax: 0.10.0
libtpu: 0.0.40
codegen_flags: <defaults>
</compile_context>

<pallas_src>
from functools import partial

import jax
import jax.numpy as jnp
from jax.experimental import pallas as pl
from jax.experimental.pallas import tpu as pltpu


# ---------------------------------------------------------------------------
# Kernels
# ---------------------------------------------------------------------------

def _conv_kernel_fullfold(x_ref, w_ref, b_ref, o_ref, *, TH, Wp, CKK, Cout_pad):
    """Small-Cin path: kh and kw both folded into the contraction (depth K*K*Cin).

    x_ref: (1, TH, Wp, CKK) bf16   w_ref: (CKK, Cout_pad) bf16
    b_ref: (1, Cout_pad)    f32    o_ref: (1, TH, Wp, Cout_pad) bf16
    """
    x2 = x_ref[0].reshape(TH * Wp, CKK)
    y = jnp.dot(x2, w_ref[...], preferred_element_type=jnp.float32) + b_ref[...]
    o_ref[...] = y.reshape(1, TH, Wp, Cout_pad).astype(o_ref.dtype)


def _conv_kernel_bands(x_ref, halo_ref, w_ref, b_ref, o_ref, acc_ref,
                       *, TH, Wp, K, KC, Cout_pad):
    """General path: kw folded into the contraction (KC = K*Cin); kh handled as K
    per-band matmuls accumulated into a persistent f32 VMEM scratch.

    x_ref:    (1, TH, Wp, KC)       main rows of this H-tile (bf16)
    halo_ref: (1, HALO, Wp, KC)     first rows of the next tile (only K-1 used)
    w_ref:    (K, KC, Cout_pad)     one contiguous weight band per kh (bf16)
    b_ref:    (1, Cout_pad)         bias (f32)
    o_ref:    (1, TH, Wp, Cout_pad) lane-dense bf16 output tile
    acc_ref:  (TH*Wp, Cout_pad)     f32 accumulator scratch
    """
    # TODO(synk): on 256-lane MXU parts (v6e/v7x) pair kh bands into 256-wide
    #             matmul outputs to fill the MXU columns.
    x2 = x_ref[0].reshape(TH * Wp, KC)

    # Band kh = 0 initializes the accumulator (bias folded into the init).
    acc_ref[...] = (jnp.dot(x2, w_ref[0], preferred_element_type=jnp.float32)
                    + b_ref[...])

    for kh in range(1, K):
        main_rows = (TH - kh) * Wp
        # main rows kh .. TH-1           ->  output rows 0 .. TH-1-kh
        acc_ref[0:main_rows, :] += jnp.dot(
            x2[kh * Wp:TH * Wp, :], w_ref[kh],
            preferred_element_type=jnp.float32)
        # halo rows 0 .. kh-1 (next tile) -> output rows TH-kh .. TH-1
        halo2 = halo_ref[0, 0:kh].reshape(kh * Wp, KC)
        acc_ref[main_rows:TH * Wp, :] += jnp.dot(
            halo2, w_ref[kh], preferred_element_type=jnp.float32)

    o_ref[...] = acc_ref[...].reshape(1, TH, Wp, Cout_pad).astype(o_ref.dtype)


# ---------------------------------------------------------------------------
# Host-side helpers
# ---------------------------------------------------------------------------

def _round_up(x, m):
    return ((x + m - 1) // m) * m


def _vmem_capacity_bytes():
    try:
        return int(pltpu.get_tpu_info().vmem_capacity_bytes)
    except Exception:
        return 64 * 1024 * 1024  # conservative fallback (v7x per-core VMEM)


def _vmem_limit(est, cap):
    return int(min(0.85 * cap, max(est + (12 << 20), 32 << 20)))


def _choose_tile_h(H, Wp, lane_in, Cout_pad, halo_rows, n_bands, vmem_cap,
                   prefer_split):
    """Largest TH (multiple of the halo block / 8) whose VMEM working set fits
    ~70% of capacity.  If prefer_split (batch < 2), keep >= 2 H-tiles so both
    TensorCores of a multi-TC chip get work."""
    step = max(8, halo_rows)
    budget = int(0.70 * vmem_cap)
    lane_in_v = _round_up(max(lane_in, 1), 128)   # VMEM lane padding
    cout_v = _round_up(Cout_pad, 128)

    def est(th):
        in_blk = th * Wp * lane_in_v * 2                    # bf16 main block
        halo_blk = halo_rows * Wp * lane_in_v * 2           # bf16 halo block
        out_blk = th * Wp * cout_v * 2                      # bf16 output block
        w_blk = n_bands * lane_in_v * cout_v * 2 + cout_v * 4   # single-buffered
        acc = th * Wp * cout_v * 4                          # f32 accumulator
        band_tmp = th * Wp * cout_v * 4                     # live matmul result
        return 2 * (in_blk + halo_blk + out_blk) + w_blk + acc + band_tmp

    th_max = _round_up(H, step)
    cands = list(range(step, th_max + step, step))
    fitting = [t for t in cands if est(t) <= budget]
    if not fitting:
        # TODO(synk): tile W as well when a single 8-row stripe exceeds VMEM.
        th = step
    else:
        th = max(fitting)
        if prefer_split:
            while th > step and _round_up(H, th) // th < 2:
                th -= step
    return th, est(th)


def _run_with_fallback(run):
    # pipeline_mode=pl.Buffered(1) (single-buffering constant operands) is a
    # recent Pallas feature; fall back to default double-buffering if missing.
    try:
        return run(True)
    except Exception:
        return run(False)


# ---------------------------------------------------------------------------
# Forward
# ---------------------------------------------------------------------------

def conv_forward(x_nchw, weight, bias, stride=1):
    """Forward of `conv` module. x_nchw: (N, Cin, H, W); weight: (Cout, Cin, K, K)."""
    assert stride == 1  # TODO(synk): stride > 1 path of _conv not implemented
    N, Cin, H, W = x_nchw.shape
    Cout, Cin2, K, K2 = weight.shape
    assert Cin2 == Cin and K2 == K
    assert K % 2 == 1, "padding=K//2 reproduces PyTorch 'same' output only for odd K"
    pad = K // 2
    Cout_pad = _round_up(Cout, 128)
    Wp = _round_up(W, 16)                 # bf16 sublane pack -> relayout-free merges
    vmem_cap = _vmem_capacity_bytes()
    prefer_split = N < 2                  # batch already feeds megacore otherwise

    x = jnp.transpose(x_nchw, (0, 2, 3, 1)).astype(jnp.bfloat16)   # NHWC bf16
    b_pad = jnp.pad(bias.reshape(1, Cout),
                    ((0, 0), (0, Cout_pad - Cout))).astype(jnp.float32)

    full_fold = (K * Cin) < 128           # small-Cin: fold kh into contraction too

    if full_fold:
        CKK = K * K * Cin
        TH, est = _choose_tile_h(H, Wp, CKK, Cout_pad, halo_rows=0, n_bands=1,
                                 vmem_cap=vmem_cap, prefer_split=prefer_split)
        Hp = _round_up(H, TH)
        NTH = Hp // TH

        # Padded input: 'same' pads + junk rows/cols so every tile is full size.
        xp = jnp.pad(x, ((0, 0), (pad, Hp - H + pad), (pad, pad + Wp - W), (0, 0)))
        xk = jnp.concatenate(
            [xp[:, kh:kh + Hp, kw:kw + Wp, :]
             for kh in range(K) for kw in range(K)], axis=-1)   # (N, Hp, Wp, K*K*Cin)

        wt = jnp.transpose(weight, (2, 3, 1, 0)).reshape(CKK, Cout)
        wt = jnp.pad(wt, ((0, 0), (0, Cout_pad - Cout))).astype(jnp.bfloat16)

        kernel = partial(_conv_kernel_fullfold, TH=TH, Wp=Wp, CKK=CKK,
                         Cout_pad=Cout_pad)
        flops = 2 * N * Hp * Wp * CKK * Cout_pad
        bytes_acc = (xk.size * 2 + wt.size * 2 + b_pad.size * 4
                     + N * Hp * Wp * Cout_pad * 2)

        def run(buffer_consts):
            const_kw = dict(pipeline_mode=pl.Buffered(1)) if buffer_consts else {}
            return pl.pallas_call(
                kernel,
                out_shape=jax.ShapeDtypeStruct((N, Hp, Wp, Cout_pad), jnp.bfloat16),
                grid=(N, NTH),
                in_specs=[
                    pl.BlockSpec((1, TH, Wp, CKK), lambda n, t: (n, t, 0, 0)),
                    pl.BlockSpec((CKK, Cout_pad), lambda n, t: (0, 0), **const_kw),
                    pl.BlockSpec((1, Cout_pad), lambda n, t: (0, 0), **const_kw),
                ],
                out_specs=pl.BlockSpec((1, TH, Wp, Cout_pad),
                                       lambda n, t: (n, t, 0, 0)),
                compiler_params=pltpu.CompilerParams(
                    dimension_semantics=("parallel", "parallel"),
                    vmem_limit_bytes=_vmem_limit(est, vmem_cap)),
                cost_estimate=pl.CostEstimate(flops=int(flops), transcendentals=0,
                                              bytes_accessed=int(bytes_acc)),
            )(xk, wt, b_pad)

        out = _run_with_fallback(run)

    else:
        KC = K * Cin
        HALO = max(8, _round_up(K - 1, 8))       # halo block rows (>= K-1)
        TH, est = _choose_tile_h(H, Wp, KC, Cout_pad, halo_rows=HALO, n_bands=K,
                                 vmem_cap=vmem_cap, prefer_split=prefer_split)
        Hp = _round_up(H, TH)                    # TH is a multiple of HALO
        NTH = Hp // TH
        halo_blocks = TH // HALO

        # Height: 'same' top pad + zero rows so main blocks cover Hp rows and the
        # HALO-row halo block of the last tile is in range (total Hp + HALO rows).
        # Width: 'same' pads for the kw fold + junk cols up to Wp.
        xp = jnp.pad(x, ((0, 0), (pad, Hp + HALO - H - pad),
                         (pad, pad + Wp - W), (0, 0)))
        xk = jnp.concatenate([xp[:, :, kw:kw + Wp, :] for kw in range(K)],
                             axis=-1)            # (N, Hp + HALO, Wp, K*Cin)

        wt = jnp.transpose(weight, (2, 3, 1, 0)).reshape(K, KC, Cout)
        wt = jnp.pad(wt, ((0, 0), (0, 0), (0, Cout_pad - Cout))).astype(jnp.bfloat16)

        kernel = partial(_conv_kernel_bands, TH=TH, Wp=Wp, K=K, KC=KC,
                         Cout_pad=Cout_pad)
        flops = 2 * N * Hp * Wp * KC * K * Cout_pad
        bytes_acc = (xk.size * 2 * (1 + HALO / TH) + wt.size * 2 + b_pad.size * 4
                     + N * Hp * Wp * Cout_pad * 2)

        def run(buffer_consts):
            const_kw = dict(pipeline_mode=pl.Buffered(1)) if buffer_consts else {}
            return pl.pallas_call(
                kernel,
                out_shape=jax.ShapeDtypeStruct((N, Hp, Wp, Cout_pad), jnp.bfloat16),
                grid=(N, NTH),
                in_specs=[
                    # main TH rows of this tile
                    pl.BlockSpec((1, TH, Wp, KC), lambda n, t: (n, t, 0, 0)),
                    # HALO rows immediately below the tile (only K-1 are used)
                    pl.BlockSpec((1, HALO, Wp, KC),
                                 lambda n, t: (n, (t + 1) * halo_blocks, 0, 0)),
                    pl.BlockSpec((K, KC, Cout_pad), lambda n, t: (0, 0, 0),
                                 **const_kw),
                    pl.BlockSpec((1, Cout_pad), lambda n, t: (0, 0), **const_kw),
                ],
                out_specs=pl.BlockSpec((1, TH, Wp, Cout_pad),
                                       lambda n, t: (n, t, 0, 0)),
                scratch_shapes=[pltpu.VMEM((TH * Wp, Cout_pad), jnp.float32)],
                compiler_params=pltpu.CompilerParams(
                    dimension_semantics=("parallel", "parallel"),
                    vmem_limit_bytes=_vmem_limit(est, vmem_cap)),
                cost_estimate=pl.CostEstimate(flops=int(flops), transcendentals=0,
                                              bytes_accessed=int(bytes_acc)),
            )(xk, xk, wt, b_pad)

        out = _run_with_fallback(run)

    # Drop H/W/Cout padding, back to NCHW and the caller's dtype.
    out = out[:, :H, :W, :Cout]
    return jnp.transpose(out, (0, 3, 1, 2)).astype(x_nchw.dtype)


# ---------------------------------------------------------------------------
# Self-test
# ---------------------------------------------------------------------------

def _reference(x, weight, bias):
    """XLA conv reference with the same bf16 operand quantization as the kernel."""
    K = weight.shape[-1]
    pad = K // 2
    xq = x.astype(jnp.bfloat16).astype(jnp.float32)
    wq = weight.astype(jnp.bfloat16).astype(jnp.float32)
    out = jax.lax.conv_general_dilated(
        xq, wq, window_strides=(1, 1), padding=((pad, pad), (pad, pad)),
        dimension_numbers=("NCHW", "OIHW", "NCHW"),
        preferred_element_type=jnp.float32)
    return out + bias.reshape(1, -1, 1, 1)


if __name__ == "__main__":
    key = jax.random.PRNGKey(0)

    def run_case(N, Cin, Cout, K, H, W, case_key):
        kx, kw = jax.random.split(case_key)
        x = jax.random.normal(kx, (N, Cin, H, W), dtype=jnp.float32)
        # _conv init: weight ~ N(0, 0.02), bias = 0
        weight = 0.02 * jax.random.normal(kw, (Cout, Cin, K, K), dtype=jnp.float32)
        bias = jnp.zeros((Cout,), dtype=jnp.float32)

        out = jax.block_until_ready(conv_forward(x, weight, bias))
        assert out.shape == (N, Cout, H, W)

        ref = _reference(x, weight, bias)
        err = float(jnp.max(jnp.abs(out - ref)))
        scale = float(jnp.max(jnp.abs(ref))) + 1e-6
        # bf16 output rounding bounds the error at ~0.4% of the value magnitude.
        assert err <= 6e-3 * scale + 1e-3, f"max abs err {err} (scale {scale})"

    # Small-Cin layer (K*Cin < 128): kh+kw fully folded into the contraction.
    run_case(N=2, Cin=4, Cout=8, K=3, H=16, W=16,
             case_key=jax.random.fold_in(key, 0))
    # Wider layer (K*Cin >= 128): per-kh band matmuls + 8-row halo path.
    run_case(N=1, Cin=64, Cout=8, K=3, H=16, W=16,
             case_key=jax.random.fold_in(key, 1))

    print("KERNEL_OK")
</pallas_src>

<mosaic_0001>
module attributes {stable_mosaic.version = 11 : i64} {
  func.func @_conv_kernel_fullfold(%arg0: i32, %arg1: i32, %arg2: memref<1x16x16x36xbf16, #tpu.memory_space<vmem>>, %arg3: memref<36x128xbf16, #tpu.memory_space<vmem>>, %arg4: memref<1x128xf32, #tpu.memory_space<vmem>>, %arg5: memref<1x16x16x128xbf16, #tpu.memory_space<vmem>>) attributes {dimension_semantics = [#tpu.dimension_semantics<parallel>, #tpu.dimension_semantics<parallel>], iteration_bounds = array<i64: 2, 1>, scalar_prefetch = 0 : i64, scratch_operands = 0 : i64, tpu.core_type = #tpu.core_type<tc>, window_params = [{transform_indices = @transform_0, window_bounds = array<i64: 1, 16, 16, 36>}, {pipeline_mode = #tpu.pipeline_mode<synchronous>, transform_indices = @transform_1, window_bounds = array<i64: 36, 128>}, {pipeline_mode = #tpu.pipeline_mode<synchronous>, transform_indices = @transform_2, window_bounds = array<i64: 1, 128>}, {transform_indices = @transform_3, window_bounds = array<i64: 1, 16, 16, 128>}]} {
    %c0 = arith.constant 0 : index
    %c0_0 = arith.constant 0 : index
    %c0_1 = arith.constant 0 : index
    %c0_2 = arith.constant 0 : index
    %0 = vector.load %arg2[%c0, %c0_0, %c0_1, %c0_2] : memref<1x16x16x36xbf16, #tpu.memory_space<vmem>>, vector<1x16x16x36xbf16>
    %1 = vector.shape_cast %0 : vector<1x16x16x36xbf16> to vector<16x16x36xbf16>
    %2 = vector.shape_cast %1 : vector<16x16x36xbf16> to vector<256x36xbf16>
    %c0_3 = arith.constant 0 : index
    %c0_4 = arith.constant 0 : index
    %3 = vector.load %arg3[%c0_3, %c0_4] : memref<36x128xbf16, #tpu.memory_space<vmem>>, vector<36x128xbf16>
    %cst = arith.constant dense<0.000000e+00> : vector<256x128xf32>
    %4 = tpu.matmul %2, %3, %cst {dimension_numbers = #tpu.dot_dimension_numbers<[1], [0], [0], [1], [0, 0, 1, 1], [], []>} : vector<256x36xbf16>, vector<36x128xbf16>, vector<256x128xf32> -> vector<256x128xf32>
    %c0_5 = arith.constant 0 : index
    %c0_6 = arith.constant 0 : index
    %5 = vector.load %arg4[%c0_5, %c0_6] : memref<1x128xf32, #tpu.memory_space<vmem>>, vector<1x128xf32>
    %6 = vector.broadcast %5 : vector<1x128xf32> to vector<256x128xf32>
    %7 = arith.addf %4, %6 : vector<256x128xf32>
    %8 = vector.shape_cast %7 : vector<256x128xf32> to vector<1x16x16x128xf32>
    %9 = arith.truncf %8 : vector<1x16x16x128xf32> to vector<1x16x16x128xbf16>
    %c0_7 = arith.constant 0 : index
    %c0_8 = arith.constant 0 : index
    %c0_9 = arith.constant 0 : index
    %c0_10 = arith.constant 0 : index
    %10 = vector.load %arg5[%c0_7, %c0_8, %c0_9, %c0_10] : memref<1x16x16x128xbf16, #tpu.memory_space<vmem>>, vector<1x16x16x128xbf16>
    tpu.vector_store %arg5[%c0_7, %c0_8, %c0_9, %c0_10], %9 {strides = array<i32>} : memref<1x16x16x128xbf16, #tpu.memory_space<vmem>>, vector<1x16x16x128xbf16>,
    return
  }
  func.func @transform_0(%arg0: i32, %arg1: i32) -> (i32, i32, i32, i32) {
    %c0_i32 = arith.constant 0 : i32
    %c0_i32_0 = arith.constant 0 : i32
    %c0_i32_1 = arith.constant 0 : i32
    return %arg0, %arg1, %c0_i32, %c0_i32_0 : i32, i32, i32, i32
  }
  func.func @transform_1(%arg0: i32, %arg1: i32) -> (i32, i32) {
    %c0_i32 = arith.constant 0 : i32
    %c0_i32_0 = arith.constant 0 : i32
    %c0_i32_1 = arith.constant 0 : i32
    return %c0_i32, %c0_i32_0 : i32, i32
  }
  func.func @transform_2(%arg0: i32, %arg1: i32) -> (i32, i32) {
    %c0_i32 = arith.constant 0 : i32
    %c0_i32_0 = arith.constant 0 : i32
    %c0_i32_1 = arith.constant 0 : i32
    return %c0_i32, %c0_i32_0 : i32, i32
  }
  func.func @transform_3(%arg0: i32, %arg1: i32) -> (i32, i32, i32, i32) {
    %c0_i32 = arith.constant 0 : i32
    %c0_i32_0 = arith.constant 0 : i32
    %c0_i32_1 = arith.constant 0 : i32
    return %arg0, %arg1, %c0_i32, %c0_i32_0 : i32, i32, i32, i32
  }
}

module attributes {stable_mosaic.version = 11 : i64} {
  func.func @_conv_kernel_fullfold(%arg0: i32, %arg1: i32, %arg2: memref<1x16x16x36xbf16, #tpu.memory_space<vmem>>, %arg3: memref<36x128xbf16, #tpu.memory_space<vmem>>, %arg4: memref<1x128xf32, #tpu.memory_space<vmem>>, %arg5: memref<1x16x16x128xbf16, #tpu.memory_space<vmem>>) attributes {dimension_semantics = [#tpu.dimension_semantics<parallel>, #tpu.dimension_semantics<parallel>], iteration_bounds = array<i64: 2, 1>, scalar_prefetch = 0 : i64, scratch_operands = 0 : i64, tpu.core_type = #tpu.core_type<tc>, window_params = [{transform_indices = @transform_0, window_bounds = array<i64: 1, 16, 16, 36>}, {pipeline_mode = #tpu.pipeline_mode<synchronous>, transform_indices = @transform_1, window_bounds = array<i64: 36, 128>}, {pipeline_mode = #tpu.pipeline_mode<synchronous>, transform_indices = @transform_2, window_bounds = array<i64: 1, 128>}, {transform_indices = @transform_3, window_bounds = array<i64: 1, 16, 16, 128>}]} {
    %c0 = arith.constant 0 : index
    %c0_0 = arith.constant 0 : index
    %c0_1 = arith.constant 0 : index
    %c0_2 = arith.constant 0 : index
    %0 = vector.load %arg2[%c0, %c0_0, %c0_1, %c0_2] : memref<1x16x16x36xbf16, #tpu.memory_space<vmem>>, vector<1x16x16x36xbf16>
    %1 = vector.shape_cast %0 : vector<1x16x16x36xbf16> to vector<16x16x36xbf16>
    %2 = vector.shape_cast %1 : vector<16x16x36xbf16> to vector<256x36xbf16>
    %c0_3 = arith.constant 0 : index
    %c0_4 = arith.constant 0 : index
    %3 = vector.load %arg3[%c0_3, %c0_4] : memref<36x128xbf16, #tpu.memory_space<vmem>>, vector<36x128xbf16>
    %cst = arith.constant dense<0.000000e+00> : vector<256x128xf32>
    %4 = tpu.matmul %2, %3, %cst {dimension_numbers = #tpu.dot_dimension_numbers<[1], [0], [0], [1], [0, 0, 1, 1], [], []>} : vector<256x36xbf16>, vector<36x128xbf16>, vector<256x128xf32> -> vector<256x128xf32>
    %c0_5 = arith.constant 0 : index
    %c0_6 = arith.constant 0 : index
    %5 = vector.load %arg4[%c0_5, %c0_6] : memref<1x128xf32, #tpu.memory_space<vmem>>, vector<1x128xf32>
    %6 = vector.broadcast %5 : vector<1x128xf32> to vector<256x128xf32>
    %7 = arith.addf %4, %6 : vector<256x128xf32>
    %8 = vector.shape_cast %7 : vector<256x128xf32> to vector<1x16x16x128xf32>
    %9 = arith.truncf %8 : vector<1x16x16x128xf32> to vector<1x16x16x128xbf16>
    %c0_7 = arith.constant 0 : index
    %c0_8 = arith.constant 0 : index
    %c0_9 = arith.constant 0 : index
    %c0_10 = arith.constant 0 : index
    %10 = vector.load %arg5[%c0_7, %c0_8, %c0_9, %c0_10] : memref<1x16x16x128xbf16, #tpu.memory_space<vmem>>, vector<1x16x16x128xbf16>
    tpu.vector_store %arg5[%c0_7, %c0_8, %c0_9, %c0_10], %9 {strides = array<i32>} : memref<1x16x16x128xbf16, #tpu.memory_space<vmem>>, vector<1x16x16x128xbf16>,
    return
  }
  func.func @transform_0(%arg0: i32, %arg1: i32) -> (i32, i32, i32, i32) {
    %c0_i32 = arith.constant 0 : i32
    %c0_i32_0 = arith.constant 0 : i32
    %c0_i32_1 = arith.constant 0 : i32
    return %arg0, %arg1, %c0_i32, %c0_i32_0 : i32, i32, i32, i32
  }
  func.func @transform_1(%arg0: i32, %arg1: i32) -> (i32, i32) {
    %c0_i32 = arith.constant 0 : i32
    %c0_i32_0 = arith.constant 0 : i32
    %c0_i32_1 = arith.constant 0 : i32
    return %c0_i32, %c0_i32_0 : i32, i32
  }
  func.func @transform_2(%arg0: i32, %arg1: i32) -> (i32, i32) {
    %c0_i32 = arith.constant 0 : i32
    %c0_i32_0 = arith.constant 0 : i32
    %c0_i32_1 = arith.constant 0 : i32
    return %c0_i32, %c0_i32_0 : i32, i32
  }
  func.func @transform_3(%arg0: i32, %arg1: i32) -> (i32, i32, i32, i32) {
    %c0_i32 = arith.constant 0 : i32
    %c0_i32_0 = arith.constant 0 : i32
    %c0_i32_1 = arith.constant 0 : i32
    return %arg0, %arg1, %c0_i32, %c0_i32_0 : i32, i32, i32, i32
  }
}

</mosaic_0001>

<bundles_post_ra>
// kernel: tpu_custom_call.1
= control target key start
LH: loop header
LB: loop body
LE: loop exit
PB: predicated region body
PF: predicated region fallthrough
CT: control target
= control target key end

     0   :  { %s1417_s0 = inlined_call_operand.hbm [shape: bf16[2,16,16,36], index: 0, kind: input, shape index: {}]   ;;  %s1418_s1 = inlined_call_operand.hbm [shape: bf16[36,128], index: 1, kind: input, shape index: {}]   ;;  %s1419_s2 = inlined_call_operand.vmem [shape: f32[1,128], index: 2, kind: input, shape index: {}]   ;;  %s1420_s3 = inlined_call_operand.hbm [shape: bf16[2,16,16,128], index: 3, kind: output, shape index: {}]  }
   0x1   :  { %1422 = sst [smem:[#allocation11_spill]] %s1418_s1 }
   0x2   :  { %8 = vsyncpa [#allocation3], 0 }
   0x3   :  { %10 = vsyncpa [#allocation3 + $0x1], 0 }
   0x4   :  { %11 = vsyncpa [#allocation6], 0 }
   0x5   :  { %12 = vsyncpa [#allocation4], 0 }
   0x6   :  { %14 = vsyncpa [#allocation4 + $0x1], 0  ;;  %s1168_s12 = smov 0   ;;  %s1170_s13 = smov 0  }
   0x7   :  { %s1172_s14 = smov 0   ;;  %s1174_s15 = smov 0  }
   0x8   :  { %s1176_s16 = smov 0   ;;  %s1178_s17 = smov 0  }
   0x9 LB: > { %s688_s18 = sadd.s32 4294967295, %s1141_s17   ;;  %s689_s19 = sadd.s32 4294967294, %s1141_s17   ;;  %s1141_s17 = sphi %s1178_s17, %s20_s17   ;;  %s1137_s16 = sphi %s1176_s16, %s1436_s16   ;;  %s1133_s15 = sphi %s1174_s15, %s1435_s15   ;;  %s1129_s14 = sphi %s1172_s14, %s1434_s14   ;;  %s1125_s13 = sphi %s1170_s13, %s1433_s13   ;;  %s1121_s12 = sphi %s1168_s12, %s1432_s12  }
   0xa   : > { %p54_p0 = scmp.ne.s32.totalorder %s1125_s13, %s1121_s12  ;;  %p1202_p1 = scmp.eq.s32.totalorder %s688_s18, 0 }
   0xb   : > { %p1206_p2 = scmp.eq.s32.totalorder %s688_s18, 1  ;;  %p128_p3 = scmp.eq.s32.totalorder %s689_s19, 1 }
   0xc   : > { %p1212_p4 = por %p1202_p1, %p54_p0  ;;  %p690_p5 = scmp.ge.s32.totalorder %s1141_s17, 1 }
   0xd   : > { %p1217_p6 = por %p128_p3, %p54_p0  ;;  %p135_p7 = scmp.lt.s32.totalorder %s1141_s17, 3 }
   0xe   : > { %s1427_s1 = sld [smem:[#allocation11_spill]]  ;;  %s1143_s28 = smov [#allocation5]  }
   0xf   : > { %p1225_p8 = pnand %p690_p5, %p135_p7  ;;  %s148_s29 = sshll.u32 %s1143_s28, 4  ;;  %s149_s29 = int_to_ptr.vmem [resolvable:$true] %s148_s29 }
  0x10   : > { %p692_p11 = scmp.ge.s32.totalorder %s1141_s17, 2  ;;  %s1421_s30 = smov 64  }
  0x11   : > { %p925_p9 = pneg %p1225_p8  ;;  %s1145_s4 = smov 4  }
  0x12   : > { %s32_s5 = sadd.s32 1, %s1137_s16  ;;  %s41_s6 = sadd.s32 1, %s1129_s14 }
  0x13   : > { %p926_p10 = pnand %p925_p9, %p1202_p1  ;;  %p34_p12 = scmp.ge.s32.totalorder %s32_s5, 2 }
  0x14   : > { %s146_s26 = sshll.u32 %s1427_s1, 4  ;;  %p48_p13 = scmp.ne.s32.totalorder %s1129_s14, %s1125_s13  ;;  %s147_s26 = int_to_ptr.hbm [resolvable:$true] %s146_s26 }
  0x15   : > { %928 = dma.hbm_to_vmem [thread:$0]  (!%p926_p10), %s147_s26, 320, %s149_s29, [#allocation6], %s1421_s30, %s1421_s30, %s1145_s4  }
  0x16   : > { %p49_p0 = scmp.eq.s32.totalorder %s1141_s17, 0  ;;  %s1438_s5 = smov (%p34_p12, %s32_s5), 0 }
  0x17   : > { %p1250_p5 = por %p1206_p2, %p48_p13  ;;  %s36_s9 = ssub.s32 %s1137_s16, %s1438_s5 }
  0x18   : > { %p1244_p3 = por %p49_p0, %p48_p13  ;;  %p938_p7 = scmp.lt.s32.totalorder %s1141_s17, 2 }
  0x19   : > { %p39_p9 = scmp.eq.s32.totalorder %s36_s9, 0  ;;  %s165_s10 = sand.u32 1, %s1129_s14  }
  0x1a   : > { %s693_s11 = sshll.u32 %s165_s10, 7  ;;  %s793_s19 = sshll.u32 %s1137_s16, 7 }
  0x1b   : > { %s1259_s18 = scalar_select %p39_p9, %s1129_s14, %s41_s6  }
  0x1c   : > { %s177_s26 = scalar_lea.hbm %s1417_s0, %s793_s19  ;;  %s169_s28 = scalar_lea.vmem [#allocation2], %s693_s11 }
  0x1d   : > { %s180_s29 = sshll.u32 %s169_s28, 4  ;;  %s178_s21 = sshll.u32 %s177_s26, 4  ;;  %s181_s29 = int_to_ptr.vmem [resolvable:$true] %s180_s29  ;;  %s179_s21 = int_to_ptr.hbm [resolvable:$true] %s178_s21 }
  0x1e   : > { %p930_p2 = pnand %p938_p7, %p1244_p3  ;;  %s166_s30 = scalar_lea.sflag [#allocation3], %s165_s10 }
  0x1f   : > { %s1431_s1 = smov 64   ;;  %192 = sbr.rel (%p1225_p8) target bundleno = 254 (0xfe), region = 32 }
  0x20   : > { %932 = dma.hbm_to_vmem [thread:$0]  (!%p930_p2), %s179_s21, 2048, %s181_s29, %s166_s30, %s1431_s1, %s1431_s1, %s1145_s4  }
  0x21   : > { %s1273_s6 = sand.u32 (!%p1225_p8), 1, %s1125_s13  }
  0x22   : > { %s697_s9 = sshll.u32 (!%p1225_p8), %s1273_s6, 7  ;;  %s195_s11 = scalar_lea.sflag (!%p1225_p8), [#allocation3], %s1273_s6 }
  0x23   : > { %s1279_s7 = scalar_lea.vmem (!%p1225_p8), [#allocation2], %s697_s9 }
  0x24   : > { %1108 = dma.done.wait (%p1212_p4), %s195_s11, 2048  }
  0x25   : > { %1110 = vsyncadd (%p1212_p4), %s195_s11, 4294965248 }
  0x26   : > { %1112 = dma.done.wait (%p1202_p1), [#allocation6], 320  }
  0x27   : > { %1114 = vsyncadd (%p1202_p1), [#allocation6], 4294966976  ;;  %v266_v0 = vld [vmem:[#allocation5 + $0x10] sm:$0x3]  ;;  %vm415_vm0 = vcmask 1041408   ;;  %v811_v4 = vld [vmem:[#allocation5 + $0x8] sm:$0xff] }
  0x28   : > { %v360_v1 = vunpack.c.l.b16 %v266_v0  ;;  %v810_v5 = vld [vmem:[#allocation5] sm:$0xff]  ;;  %vm366_vm1 = vcmask 293888   ;;  %v795_v10 = vld [vmem:[%s1279_s7 + $0x8] sm:$0xff]  ;;  %v796_v14 = vld [vmem:[%s1279_s7 + $0x10] sm:$0xff]  ;;  %s1332_s22 = scalar_lea.vmem [#allocation7], %s697_s9  ;;  %s812_s27 = sshll.u32 %s1133_s15, 7 }
  0x29   : > { %v794_v6 = vld [vmem:[%s1279_s7] sm:$0xff]  ;;  %v799_v11 = vld [vmem:[%s1279_s7 + $0x28] sm:$0xff]  ;;  %v800_v15 = vld [vmem:[%s1279_s7 + $0x30] sm:$0xff]  ;;  %s587_s10 = scalar_lea.hbm %s1420_s3, %s812_s27  ;;  %s588_s19 = sshll.u32 %s1332_s22, 4  ;;  %s589_s19 = int_to_ptr.vmem [resolvable:$true] %s588_s19 }
  0x2a   : > { %v363_v2 = vpack.c.b16 %v360_v1, %v360_v1  ;;  %v798_v7 = vld [vmem:[%s1279_s7 + $0x20] sm:$0xff]  ;;  %v803_v12 = vld [vmem:[%s1279_s7 + $0x48] sm:$0xff]  ;;  %v804_v16 = vld [vmem:[%s1279_s7 + $0x50] sm:$0xff]  ;;  %s590_s24 = sshll.u32 %s587_s10, 4  ;;  %s573_s15 = scalar_lea.sflag [#allocation4], %s1273_s6  ;;  %s591_s24 = int_to_ptr.hbm [resolvable:$true] %s590_s24 }
  0x2b   : > { %v802_v8 = vld [vmem:[%s1279_s7 + $0x40] sm:$0xff]  ;;  %v807_v13 = vld [vmem:[%s1279_s7 + $0x68] sm:$0xff]  ;;  %v808_v17 = vld [vmem:[%s1279_s7 + $0x70] sm:$0xff]  ;;  %s1069_s25 = sshra.s32 %s591_s24, 4  ;;  %s1075_s21 = scalar_lea.hbm %s1420_s3, 256  ;;  %s1070_s25 = int_to_ptr.hbm [resolvable:$true] %s1069_s25 }
  0x2c   : > { %v417_v3 = vsel %vm415_vm0, %v363_v2, 0  ;;  %v806_v9 = vld [vmem:[%s1279_s7 + $0x60] sm:$0xff]  ;;  %v797_v18 = vld [vmem:[%s1279_s7 + $0x18] sm:$0xff]  ;;  %s1071_s26 = scalar_lea.hbm %s1070_s25, 128  ;;  %p1076_p10 = scmp.lt.s32.totalorder %s1070_s25, %s1420_s3 }
  0x2d   : > { %424 = vmatpush.bf16.msra.mxu0 %v417_v3  ;;  %908 = vmatpush.bf16.msra.mxu1 %v417_v3  ;;  %v801_v19 = vld [vmem:[%s1279_s7 + $0x38] sm:$0xff]  ;;  %v1324_v24 = vld [vmem:[%s1419_s2] ss:$0 sm:$0xff]  ;;  %p1072_p1 = scmp.ne.s32.totalorder %s1070_s25, %s1071_s26  ;;  %p1077_p12 = scmp.lt.s32.totalorder %s1075_s21, %s1071_s26 }
  0x2e   : > { %909 = vmatpush.bf16.msra.mxu2 %v417_v3  ;;  %910 = vmatpush.bf16.msra.mxu3 %v417_v3  ;;  %v805_v20 = vld [vmem:[%s1279_s7 + $0x58] sm:$0xff] }
  0x2f   : > { %v809_v21 = vld [vmem:[%s1279_s7 + $0x78] sm:$0xff]  ;;  %p1073_p4 = pnand %p1072_p1, %p1250_p5  ;;  %p1078_p13 = por %p1077_p12, %p1076_p10 }
  0x31   : > { %425 = vmatpush.bf16.msra.mxu0 %v811_v4  ;;  %911 = vmatpush.bf16.msra.mxu1 %v811_v4  ;;  %p1074_p8 = pneg %p1073_p4 }
  0x32   : > { %912 = vmatpush.bf16.msra.mxu2 %v811_v4  ;;  %913 = vmatpush.bf16.msra.mxu3 %v811_v4 }
  0x33   : > { %p1079_p0 = pnand %p1078_p13, %p1074_p8 }
  0x35   : > { %426 = vmatpush.bf16.msra.mxu0 %v810_v5  ;;  %914 = vmatpush.bf16.msra.mxu1 %v810_v5 }
  0x36   : > { %915 = vmatpush.bf16.msra.mxu2 %v810_v5  ;;  %916 = vmatpush.bf16.msra.mxu3 %v810_v5 }
  0x38   : > { %772 = vmatmul.msk.bf16.vlgmr.msra.gmra.mxu0 %vm366_vm1, %v794_v6  ;;  %776 = vmatmul.msk.bf16.vlgmr.msra.gmra.mxu1 %vm366_vm1, %v798_v7 }
  0x39   : > { %780 = vmatmul.msk.bf16.vlgmr.msra.gmra.mxu2 %vm366_vm1, %v802_v8  ;;  %784 = vmatmul.msk.bf16.vlgmr.msra.gmra.mxu3 %vm366_vm1, %v806_v9 }
  0x48   : > { %773 = vmatmul.msk.bf16.gmra.mxu0 %vm366_vm1, %v795_v10  ;;  %777 = vmatmul.msk.bf16.gmra.mxu1 %vm366_vm1, %v799_v11 }
  0x49   : > { %781 = vmatmul.msk.bf16.gmra.mxu2 %vm366_vm1, %v803_v12  ;;  %785 = vmatmul.msk.bf16.gmra.mxu3 %vm366_vm1, %v807_v13 }
  0x58   : > { %774 = vmatmul.msk.bf16.gmra.mxu0 %vm366_vm1, %v796_v14  ;;  %778 = vmatmul.msk.bf16.gmra.mxu1 %vm366_vm1, %v800_v15 }
  0x59   : > { %782 = vmatmul.msk.bf16.gmra.mxu2 %vm366_vm1, %v804_v16  ;;  %786 = vmatmul.msk.bf16.gmra.mxu3 %vm366_vm1, %v808_v17 }
  0x68   : > { %775 = vmatmul.msk.bf16.gmra.mxu0 %vm366_vm1, %v797_v18  ;;  %779 = vmatmul.msk.bf16.gmra.mxu1 %vm366_vm1, %v801_v19 }
  0x69   : > { %783 = vmatmul.msk.bf16.gmra.mxu2 %vm366_vm1, %v805_v20  ;;  %787 = vmatmul.msk.bf16.gmra.mxu3 %vm366_vm1, %v809_v21 }
  0xb5   : > { %v428_v22 = vpop.f32.mrf.mxu0  ;;  %v448_v23 = vpop.f32.mrf.mxu1 }
  0xb6   : > { %v429_v29 = vadd.f32 %v1324_v24, %v428_v22  ;;  %v449_v30 = vadd.f32 %v1324_v24, %v448_v23 }
  0xbc   : > { %v468_v25 = vpop.f32.mrf.mxu2  ;;  %v488_v26 = vpop.f32.mrf.mxu3 }
  0xbd   : > { %v430_v27 = vpop.f32.mrf.mxu0  ;;  %v450_v28 = vpop.f32.mrf.mxu1  ;;  %v469_v37 = vadd.f32 %v1324_v24, %v468_v25  ;;  %v489_v38 = vadd.f32 %v1324_v24, %v488_v26 }
  0xbe   : > { %v431_v31 = vadd.f32 %v1324_v24, %v430_v27  ;;  %v451_v32 = vadd.f32 %v1324_v24, %v450_v28 }
  0xc0   : > { %v816_v33 = vpack.c.bf16 %v431_v31, %v429_v29  ;;  %v836_v34 = vpack.c.bf16 %v451_v32, %v449_v30 }
  0xc2   : > { %817 = vst [vmem:[%s1332_s22] sm:$0xff] %v816_v33  }
  0xc3   : > { %896 = vst [vmem:[%s1332_s22 + $0x20] sm:$0xff] %v836_v34  }
  0xc4   : > { %v470_v35 = vpop.f32.mrf.mxu2  ;;  %v490_v36 = vpop.f32.mrf.mxu3 }
  0xc5   : > { %v471_v39 = vadd.f32 %v1324_v24, %v470_v35  ;;  %v491_v40 = vadd.f32 %v1324_v24, %v490_v36  ;;  %v433_v41 = vpop.f32.mrf.mxu0  ;;  %v453_v42 = vpop.f32.mrf.mxu1 }
  0xc6   : > { %v434_v49 = vadd.f32 %v1324_v24, %v433_v41  ;;  %v454_v50 = vadd.f32 %v1324_v24, %v453_v42 }
  0xc7   : > { %v856_v43 = vpack.c.bf16 %v471_v39, %v469_v37  ;;  %v876_v44 = vpack.c.bf16 %v491_v40, %v489_v38 }
  0xc9   : > { %900 = vst [vmem:[%s1332_s22 + $0x40] sm:$0xff] %v856_v43  }
  0xca   : > { %904 = vst [vmem:[%s1332_s22 + $0x60] sm:$0xff] %v876_v44  }
  0xcc   : > { %v473_v45 = vpop.f32.mrf.mxu2  ;;  %v493_v46 = vpop.f32.mrf.mxu3 }
  0xcd   : > { %v435_v47 = vpop.f32.mrf.mxu0  ;;  %v455_v48 = vpop.f32.mrf.mxu1  ;;  %v474_v57 = vadd.f32 %v1324_v24, %v473_v45  ;;  %v494_v58 = vadd.f32 %v1324_v24, %v493_v46 }
  0xce   : > { %v436_v51 = vadd.f32 %v1324_v24, %v435_v47  ;;  %v456_v52 = vadd.f32 %v1324_v24, %v455_v48 }
  0xd0   : > { %v821_v53 = vpack.c.bf16 %v436_v51, %v434_v49  ;;  %v841_v54 = vpack.c.bf16 %v456_v52, %v454_v50 }
  0xd2   : > { %893 = vst [vmem:[%s1332_s22 + $0x8] sm:$0xff] %v821_v53  }
  0xd3   : > { %897 = vst [vmem:[%s1332_s22 + $0x28] sm:$0xff] %v841_v54  }
  0xd4   : > { %v475_v55 = vpop.f32.mrf.mxu2  ;;  %v495_v56 = vpop.f32.mrf.mxu3 }
  0xd5   : > { %v476_v59 = vadd.f32 %v1324_v24, %v475_v55  ;;  %v496_v60 = vadd.f32 %v1324_v24, %v495_v56  ;;  %v438_v61 = vpop.f32.mrf.mxu0  ;;  %v458_v62 = vpop.f32.mrf.mxu1 }
  0xd6   : > { %v439_v5 = vadd.f32 %v1324_v24, %v438_v61  ;;  %v459_v6 = vadd.f32 %v1324_v24, %v458_v62 }
  0xd7   : > { %v861_v63 = vpack.c.bf16 %v476_v59, %v474_v57  ;;  %v881_v0 = vpack.c.bf16 %v496_v60, %v494_v58 }
  0xd9   : > { %901 = vst [vmem:[%s1332_s22 + $0x48] sm:$0xff] %v861_v63  }
  0xda   : > { %905 = vst [vmem:[%s1332_s22 + $0x68] sm:$0xff] %v881_v0  }
  0xdc   : > { %v478_v1 = vpop.f32.mrf.mxu2  ;;  %v498_v2 = vpop.f32.mrf.mxu3 }
  0xdd   : > { %v440_v3 = vpop.f32.mrf.mxu0  ;;  %v460_v4 = vpop.f32.mrf.mxu1  ;;  %v479_v13 = vadd.f32 %v1324_v24, %v478_v1  ;;  %v499_v14 = vadd.f32 %v1324_v24, %v498_v2 }
  0xde   : > { %v441_v7 = vadd.f32 %v1324_v24, %v440_v3  ;;  %v461_v8 = vadd.f32 %v1324_v24, %v460_v4 }
  0xe0   : > { %v826_v9 = vpack.c.bf16 %v441_v7, %v439_v5  ;;  %v846_v10 = vpack.c.bf16 %v461_v8, %v459_v6 }
  0xe2   : > { %894 = vst [vmem:[%s1332_s22 + $0x10] sm:$0xff] %v826_v9  }
  0xe3   : > { %898 = vst [vmem:[%s1332_s22 + $0x30] sm:$0xff] %v846_v10  }
  0xe4   : > { %v480_v11 = vpop.f32.mrf.mxu2  ;;  %v500_v12 = vpop.f32.mrf.mxu3 }
  0xe5   : > { %v481_v15 = vadd.f32 %v1324_v24, %v480_v11  ;;  %v501_v16 = vadd.f32 %v1324_v24, %v500_v12  ;;  %v443_v17 = vpop.f32.mrf.mxu0  ;;  %v463_v18 = vpop.f32.mrf.mxu1 }
  0xe6   : > { %v444_v26 = vadd.f32 %v1324_v24, %v443_v17  ;;  %v464_v27 = vadd.f32 %v1324_v24, %v463_v18 }
  0xe7   : > { %v866_v19 = vpack.c.bf16 %v481_v15, %v479_v13  ;;  %v886_v20 = vpack.c.bf16 %v501_v16, %v499_v14 }
  0xe9   : > { %902 = vst [vmem:[%s1332_s22 + $0x50] sm:$0xff] %v866_v19  }
  0xea   : > { %906 = vst [vmem:[%s1332_s22 + $0x70] sm:$0xff] %v886_v20  }
  0xec   : > { %v483_v21 = vpop.f32.mrf.mxu2  ;;  %v503_v22 = vpop.f32.mrf.mxu3 }
  0xed   : > { %v445_v23 = vpop.f32.mrf.mxu0  ;;  %v465_v25 = vpop.f32.mrf.mxu1  ;;  %v484_v34 = vadd.f32 %v1324_v24, %v483_v21  ;;  %v504_v35 = vadd.f32 %v1324_v24, %v503_v22 }
  0xee   : > { %v446_v28 = vadd.f32 %v1324_v24, %v445_v23  ;;  %v466_v29 = vadd.f32 %v1324_v24, %v465_v25 }
  0xf0   : > { %v831_v30 = vpack.c.bf16 %v446_v28, %v444_v26  ;;  %v851_v31 = vpack.c.bf16 %v466_v29, %v464_v27 }
  0xf2   : > { %895 = vst [vmem:[%s1332_s22 + $0x18] sm:$0xff] %v831_v30  }
  0xf3   : > { %899 = vst [vmem:[%s1332_s22 + $0x38] sm:$0xff] %v851_v31  }
  0xf4   : > { %v485_v32 = vpop.f32.mrf.mxu2  ;;  %v505_v33 = vpop.f32.mrf.mxu3 }
  0xf5   : > { %v486_v36 = vadd.f32 %v1324_v24, %v485_v32  ;;  %v506_v37 = vadd.f32 %v1324_v24, %v505_v33 }
  0xf7   : > { %v871_v38 = vpack.c.bf16 %v486_v36, %v484_v34  ;;  %v891_v39 = vpack.c.bf16 %v506_v37, %v504_v35 }
  0xf9   : > { %903 = vst [vmem:[%s1332_s22 + $0x58] sm:$0xff] %v871_v38  }
  0xfa   : > { %907 = vst [vmem:[%s1332_s22 + $0x78] sm:$0xff] %v891_v39  }
  0xfb   : > { %1082 = shalt.err (!%p1079_p0)
}
  0xfc   : > { %s1146_s6 = smov 64   ;;  %s1147_s7 = smov 4  }
  0xfd   : > { %923 = dma.vmem_to_hbm [thread:$0]  (%p1250_p5), %s589_s19, 2048, %s591_s24, %s573_s15, %s1146_s6, %s1146_s6, %s1147_s7  }
  0xfe PF: > { %s605_s1 = sand.u32 1, %s1121_s12   ;;  %p934_p3 = pnand %p692_p11, %p1217_p6 }
  0xff   : > { %s606_s20 = scalar_lea.sflag [#allocation4], %s605_s1 }
 0x100   : > { %p935_p7 = pneg %p934_p3 }
 0x102   : > { %1116 = dma.done.wait (%p935_p7), %s606_s20, 2048  }
 0x103   : > { %1118 = vsyncadd (%p935_p7), %s606_s20, 4294965248  ;;  %s20_s17 = sadd.s32 1, %s1141_s17   ;;  %s1432_s12 = smov %s1125_s13 }
 0x104   : > { %p17_p9 = scmp.ge.s32.totalorder %s20_s17, 4   ;;  %s1433_s13 = smov %s1129_s14 }
 0x105   : > { %s1434_s14 = smov %s1259_s18  ;;  %s1435_s15 = smov %s1137_s16 }
 0x106   : > { %s1436_s16 = smov %s1438_s5  ;;  %19 = sbr.rel (!%p17_p9) target bundleno = 9 (0x9), region = 81 }
 0x10b   :  { %612 = vsyncpa [#allocation3], 1 }
 0x10c   :  { %614 = vsyncpa [#allocation3 + $0x1], 1 }
 0x10d   :  { %615 = vsyncpa [#allocation6], 1 }
 0x10e   :  { %616 = vsyncpa [#allocation4], 1 }
 0x10f   :  { %618 = vsyncpa [#allocation4 + $0x1], 1 }

// kernel: tpu_custom_call.1
= control target key start
LH: loop header
LB: loop body
LE: loop exit
PB: predicated region body
PF: predicated region fallthrough
CT: control target
= control target key end

     0   :  { %s1417_s0 = inlined_call_operand.hbm [shape: bf16[2,16,16,36], index: 0, kind: input, shape index: {}]   ;;  %s1418_s1 = inlined_call_operand.hbm [shape: bf16[36,128], index: 1, kind: input, shape index: {}]   ;;  %s1419_s2 = inlined_call_operand.vmem [shape: f32[1,128], index: 2, kind: input, shape index: {}]   ;;  %s1420_s3 = inlined_call_operand.hbm [shape: bf16[2,16,16,128], index: 3, kind: output, shape index: {}]  }
   0x1   :  { %1422 = sst [smem:[#allocation11_spill]] %s1418_s1 }
   0x2   :  { %8 = vsyncpa [#allocation3], 0 }
   0x3   :  { %10 = vsyncpa [#allocation3 + $0x1], 0 }
   0x4   :  { %11 = vsyncpa [#allocation6], 0 }
   0x5   :  { %12 = vsyncpa [#allocation4], 0 }
   0x6   :  { %14 = vsyncpa [#allocation4 + $0x1], 0  ;;  %s1168_s12 = smov 0   ;;  %s1170_s13 = smov 0  }
   0x7   :  { %s1172_s14 = smov 0   ;;  %s1174_s15 = smov 0  }
   0x8   :  { %s1176_s16 = smov 0   ;;  %s1178_s17 = smov 0  }
   0x9 LB: > { %s688_s18 = sadd.s32 4294967295, %s1141_s17   ;;  %s689_s19 = sadd.s32 4294967294, %s1141_s17   ;;  %s1141_s17 = sphi %s1178_s17, %s20_s17   ;;  %s1137_s16 = sphi %s1176_s16, %s1436_s16   ;;  %s1133_s15 = sphi %s1174_s15, %s1435_s15   ;;  %s1129_s14 = sphi %s1172_s14, %s1434_s14   ;;  %s1125_s13 = sphi %s1170_s13, %s1433_s13   ;;  %s1121_s12 = sphi %s1168_s12, %s1432_s12  }
   0xa   : > { %p54_p0 = scmp.ne.s32.totalorder %s1125_s13, %s1121_s12  ;;  %p1202_p1 = scmp.eq.s32.totalorder %s688_s18, 0 }
   0xb   : > { %p1206_p2 = scmp.eq.s32.totalorder %s688_s18, 1  ;;  %p128_p3 = scmp.eq.s32.totalorder %s689_s19, 1 }
   0xc   : > { %p1212_p4 = por %p1202_p1, %p54_p0  ;;  %p690_p5 = scmp.ge.s32.totalorder %s1141_s17, 1 }
   0xd   : > { %p1217_p6 = por %p128_p3, %p54_p0  ;;  %p135_p7 = scmp.lt.s32.totalorder %s1141_s17, 3 }
   0xe   : > { %s1427_s1 = sld [smem:[#allocation11_spill]]  ;;  %s1143_s28 = smov [#allocation5]  }
   0xf   : > { %p1225_p8 = pnand %p690_p5, %p135_p7  ;;  %s148_s29 = sshll.u32 %s1143_s28, 4  ;;  %s149_s29 = int_to_ptr.vmem [resolvable:$true] %s148_s29 }
  0x10   : > { %p692_p11 = scmp.ge.s32.totalorder %s1141_s17, 2  ;;  %s1421_s30 = smov 64  }
  0x11   : > { %p925_p9 = pneg %p1225_p8  ;;  %s1145_s4 = smov 4  }
  0x12   : > { %s32_s5 = sadd.s32 1, %s1137_s16  ;;  %s41_s6 = sadd.s32 1, %s1129_s14 }
  0x13   : > { %p926_p10 = pnand %p925_p9, %p1202_p1  ;;  %p34_p12 = scmp.ge.s32.totalorder %s32_s5, 2 }
  0x14   : > { %s146_s26 = sshll.u32 %s1427_s1, 4  ;;  %p48_p13 = scmp.ne.s32.totalorder %s1129_s14, %s1125_s13  ;;  %s147_s26 = int_to_ptr.hbm [resolvable:$true] %s146_s26 }
  0x15   : > { %928 = dma.hbm_to_vmem [thread:$0]  (!%p926_p10), %s147_s26, 320, %s149_s29, [#allocation6], %s1421_s30, %s1421_s30, %s1145_s4  }
  0x16   : > { %p49_p0 = scmp.eq.s32.totalorder %s1141_s17, 0  ;;  %s1438_s5 = smov (%p34_p12, %s32_s5), 0 }
  0x17   : > { %p1250_p5 = por %p1206_p2, %p48_p13  ;;  %s36_s9 = ssub.s32 %s1137_s16, %s1438_s5 }
  0x18   : > { %p1244_p3 = por %p49_p0, %p48_p13  ;;  %p938_p7 = scmp.lt.s32.totalorder %s1141_s17, 2 }
  0x19   : > { %p39_p9 = scmp.eq.s32.totalorder %s36_s9, 0  ;;  %s165_s10 = sand.u32 1, %s1129_s14  }
  0x1a   : > { %s693_s11 = sshll.u32 %s165_s10, 7  ;;  %s793_s19 = sshll.u32 %s1137_s16, 7 }
  0x1b   : > { %s1259_s18 = scalar_select %p39_p9, %s1129_s14, %s41_s6  }
  0x1c   : > { %s177_s26 = scalar_lea.hbm %s1417_s0, %s793_s19  ;;  %s169_s28 = scalar_lea.vmem [#allocation2], %s693_s11 }
  0x1d   : > { %s180_s29 = sshll.u32 %s169_s28, 4  ;;  %s178_s21 = sshll.u32 %s177_s26, 4  ;;  %s181_s29 = int_to_ptr.vmem [resolvable:$true] %s180_s29  ;;  %s179_s21 = int_to_ptr.hbm [resolvable:$true] %s178_s21 }
  0x1e   : > { %p930_p2 = pnand %p938_p7, %p1244_p3  ;;  %s166_s30 = scalar_lea.sflag [#allocation3], %s165_s10 }
  0x1f   : > { %s1431_s1 = smov 64   ;;  %192 = sbr.rel (%p1225_p8) target bundleno = 254 (0xfe), region = 32 }
  0x20   : > { %932 = dma.hbm_to_vmem [thread:$0]  (!%p930_p2), %s179_s21, 2048, %s181_s29, %s166_s30, %s1431_s1, %s1431_s1, %s1145_s4  }
  0x21   : > { %s1273_s6 = sand.u32 (!%p1225_p8), 1, %s1125_s13  }
  0x22   : > { %s697_s9 = sshll.u32 (!%p1225_p8), %s1273_s6, 7  ;;  %s195_s11 = scalar_lea.sflag (!%p1225_p8), [#allocation3], %s1273_s6 }
  0x23   : > { %s1279_s7 = scalar_lea.vmem (!%p1225_p8), [#allocation2], %s697_s9 }
  0x24   : > { %1108 = dma.done.wait (%p1212_p4), %s195_s11, 2048  }
  0x25   : > { %1110 = vsyncadd (%p1212_p4), %s195_s11, 4294965248 }
  0x26   : > { %1112 = dma.done.wait (%p1202_p1), [#allocation6], 320  }
  0x27   : > { %1114 = vsyncadd (%p1202_p1), [#allocation6], 4294966976  ;;  %v266_v0 = vld [vmem:[#allocation5 + $0x10] sm:$0x3]  ;;  %vm415_vm0 = vcmask 1041408   ;;  %v811_v4 = vld [vmem:[#allocation5 + $0x8] sm:$0xff] }
  0x28   : > { %v360_v1 = vunpack.c.l.b16 %v266_v0  ;;  %v810_v5 = vld [vmem:[#allocation5] sm:$0xff]  ;;  %vm366_vm1 = vcmask 293888   ;;  %v795_v10 = vld [vmem:[%s1279_s7 + $0x8] sm:$0xff]  ;;  %v796_v14 = vld [vmem:[%s1279_s7 + $0x10] sm:$0xff]  ;;  %s1332_s22 = scalar_lea.vmem [#allocation7], %s697_s9  ;;  %s812_s27 = sshll.u32 %s1133_s15, 7 }
  0x29   : > { %v794_v6 = vld [vmem:[%s1279_s7] sm:$0xff]  ;;  %v799_v11 = vld [vmem:[%s1279_s7 + $0x28] sm:$0xff]  ;;  %v800_v15 = vld [vmem:[%s1279_s7 + $0x30] sm:$0xff]  ;;  %s587_s10 = scalar_lea.hbm %s1420_s3, %s812_s27  ;;  %s588_s19 = sshll.u32 %s1332_s22, 4  ;;  %s589_s19 = int_to_ptr.vmem [resolvable:$true] %s588_s19 }
  0x2a   : > { %v363_v2 = vpack.c.b16 %v360_v1, %v360_v1  ;;  %v798_v7 = vld [vmem:[%s1279_s7 + $0x20] sm:$0xff]  ;;  %v803_v12 = vld [vmem:[%s1279_s7 + $0x48] sm:$0xff]  ;;  %v804_v16 = vld [vmem:[%s1279_s7 + $0x50] sm:$0xff]  ;;  %s590_s24 = sshll.u32 %s587_s10, 4  ;;  %s573_s15 = scalar_lea.sflag [#allocation4], %s1273_s6  ;;  %s591_s24 = int_to_ptr.hbm [resolvable:$true] %s590_s24 }
  0x2b   : > { %v802_v8 = vld [vmem:[%s1279_s7 + $0x40] sm:$0xff]  ;;  %v807_v13 = vld [vmem:[%s1279_s7 + $0x68] sm:$0xff]  ;;  %v808_v17 = vld [vmem:[%s1279_s7 + $0x70] sm:$0xff]  ;;  %s1069_s25 = sshra.s32 %s591_s24, 4  ;;  %s1075_s21 = scalar_lea.hbm %s1420_s3, 256  ;;  %s1070_s25 = int_to_ptr.hbm [resolvable:$true] %s1069_s25 }
  0x2c   : > { %v417_v3 = vsel %vm415_vm0, %v363_v2, 0  ;;  %v806_v9 = vld [vmem:[%s1279_s7 + $0x60] sm:$0xff]  ;;  %v797_v18 = vld [vmem:[%s1279_s7 + $0x18] sm:$0xff]  ;;  %s1071_s26 = scalar_lea.hbm %s1070_s25, 128  ;;  %p1076_p10 = scmp.lt.s32.totalorder %s1070_s25, %s1420_s3 }
  0x2d   : > { %424 = vmatpush.bf16.msra.mxu0 %v417_v3  ;;  %908 = vmatpush.bf16.msra.mxu1 %v417_v3  ;;  %v801_v19 = vld [vmem:[%s1279_s7 + $0x38] sm:$0xff]  ;;  %v1324_v24 = vld [vmem:[%s1419_s2] ss:$0 sm:$0xff]  ;;  %p1072_p1 = scmp.ne.s32.totalorder %s1070_s25, %s1071_s26  ;;  %p1077_p12 = scmp.lt.s32.totalorder %s1075_s21, %s1071_s26 }
  0x2e   : > { %909 = vmatpush.bf16.msra.mxu2 %v417_v3  ;;  %910 = vmatpush.bf16.msra.mxu3 %v417_v3  ;;  %v805_v20 = vld [vmem:[%s1279_s7 + $0x58] sm:$0xff] }
  0x2f   : > { %v809_v21 = vld [vmem:[%s1279_s7 + $0x78] sm:$0xff]  ;;  %p1073_p4 = pnand %p1072_p1, %p1250_p5  ;;  %p1078_p13 = por %p1077_p12, %p1076_p10 }
  0x31   : > { %425 = vmatpush.bf16.msra.mxu0 %v811_v4  ;;  %911 = vmatpush.bf16.msra.mxu1 %v811_v4  ;;  %p1074_p8 = pneg %p1073_p4 }
  0x32   : > { %912 = vmatpush.bf16.msra.mxu2 %v811_v4  ;;  %913 = vmatpush.bf16.msra.mxu3 %v811_v4 }
  0x33   : > { %p1079_p0 = pnand %p1078_p13, %p1074_p8 }
  0x35   : > { %426 = vmatpush.bf16.msra.mxu0 %v810_v5  ;;  %914 = vmatpush.bf16.msra.mxu1 %v810_v5 }
  0x36   : > { %915 = vmatpush.bf16.msra.mxu2 %v810_v5  ;;  %916 = vmatpush.bf16.msra.mxu3 %v810_v5 }
  0x38   : > { %772 = vmatmul.msk.bf16.vlgmr.msra.gmra.mxu0 %vm366_vm1, %v794_v6  ;;  %776 = vmatmul.msk.bf16.vlgmr.msra.gmra.mxu1 %vm366_vm1, %v798_v7 }
  0x39   : > { %780 = vmatmul.msk.bf16.vlgmr.msra.gmra.mxu2 %vm366_vm1, %v802_v8  ;;  %784 = vmatmul.msk.bf16.vlgmr.msra.gmra.mxu3 %vm366_vm1, %v806_v9 }
  0x48   : > { %773 = vmatmul.msk.bf16.gmra.mxu0 %vm366_vm1, %v795_v10  ;;  %777 = vmatmul.msk.bf16.gmra.mxu1 %vm366_vm1, %v799_v11 }
  0x49   : > { %781 = vmatmul.msk.bf16.gmra.mxu2 %vm366_vm1, %v803_v12  ;;  %785 = vmatmul.msk.bf16.gmra.mxu3 %vm366_vm1, %v807_v13 }
  0x58   : > { %774 = vmatmul.msk.bf16.gmra.mxu0 %vm366_vm1, %v796_v14  ;;  %778 = vmatmul.msk.bf16.gmra.mxu1 %vm366_vm1, %v800_v15 }
  0x59   : > { %782 = vmatmul.msk.bf16.gmra.mxu2 %vm366_vm1, %v804_v16  ;;  %786 = vmatmul.msk.bf16.gmra.mxu3 %vm366_vm1, %v808_v17 }
  0x68   : > { %775 = vmatmul.msk.bf16.gmra.mxu0 %vm366_vm1, %v797_v18  ;;  %779 = vmatmul.msk.bf16.gmra.mxu1 %vm366_vm1, %v801_v19 }
  0x69   : > { %783 = vmatmul.msk.bf16.gmra.mxu2 %vm366_vm1, %v805_v20  ;;  %787 = vmatmul.msk.bf16.gmra.mxu3 %vm366_vm1, %v809_v21 }
  0xb5   : > { %v428_v22 = vpop.f32.mrf.mxu0  ;;  %v448_v23 = vpop.f32.mrf.mxu1 }
  0xb6   : > { %v429_v29 = vadd.f32 %v1324_v24, %v428_v22  ;;  %v449_v30 = vadd.f32 %v1324_v24, %v448_v23 }
  0xbc   : > { %v468_v25 = vpop.f32.mrf.mxu2  ;;  %v488_v26 = vpop.f32.mrf.mxu3 }
  0xbd   : > { %v430_v27 = vpop.f32.mrf.mxu0  ;;  %v450_v28 = vpop.f32.mrf.mxu1  ;;  %v469_v37 = vadd.f32 %v1324_v24, %v468_v25  ;;  %v489_v38 = vadd.f32 %v1324_v24, %v488_v26 }
  0xbe   : > { %v431_v31 = vadd.f32 %v1324_v24, %v430_v27  ;;  %v451_v32 = vadd.f32 %v1324_v24, %v450_v28 }
  0xc0   : > { %v816_v33 = vpack.c.bf16 %v431_v31, %v429_v29  ;;  %v836_v34 = vpack.c.bf16 %v451_v32, %v449_v30 }
  0xc2   : > { %817 = vst [vmem:[%s1332_s22] sm:$0xff] %v816_v33  }
  0xc3   : > { %896 = vst [vmem:[%s1332_s22 + $0x20] sm:$0xff] %v836_v34  }
  0xc4   : > { %v470_v35 = vpop.f32.mrf.mxu2  ;;  %v490_v36 = vpop.f32.mrf.mxu3 }
  0xc5   : > { %v471_v39 = vadd.f32 %v1324_v24, %v470_v35  ;;  %v491_v40 = vadd.f32 %v1324_v24, %v490_v36  ;;  %v433_v41 = vpop.f32.mrf.mxu0  ;;  %v453_v42 = vpop.f32.mrf.mxu1 }
  0xc6   : > { %v434_v49 = vadd.f32 %v1324_v24, %v433_v41  ;;  %v454_v50 = vadd.f32 %v1324_v24, %v453_v42 }
  0xc7   : > { %v856_v43 = vpack.c.bf16 %v471_v39, %v469_v37  ;;  %v876_v44 = vpack.c.bf16 %v491_v40, %v489_v38 }
  0xc9   : > { %900 = vst [vmem:[%s1332_s22 + $0x40] sm:$0xff] %v856_v43  }
  0xca   : > { %904 = vst [vmem:[%s1332_s22 + $0x60] sm:$0xff] %v876_v44  }
  0xcc   : > { %v473_v45 = vpop.f32.mrf.mxu2  ;;  %v493_v46 = vpop.f32.mrf.mxu3 }
  0xcd   : > { %v435_v47 = vpop.f32.mrf.mxu0  ;;  %v455_v48 = vpop.f32.mrf.mxu1  ;;  %v474_v57 = vadd.f32 %v1324_v24, %v473_v45  ;;  %v494_v58 = vadd.f32 %v1324_v24, %v493_v46 }
  0xce   : > { %v436_v51 = vadd.f32 %v1324_v24, %v435_v47  ;;  %v456_v52 = vadd.f32 %v1324_v24, %v455_v48 }
  0xd0   : > { %v821_v53 = vpack.c.bf16 %v436_v51, %v434_v49  ;;  %v841_v54 = vpack.c.bf16 %v456_v52, %v454_v50 }
  0xd2   : > { %893 = vst [vmem:[%s1332_s22 + $0x8] sm:$0xff] %v821_v53  }
  0xd3   : > { %897 = vst [vmem:[%s1332_s22 + $0x28] sm:$0xff] %v841_v54  }
  0xd4   : > { %v475_v55 = vpop.f32.mrf.mxu2  ;;  %v495_v56 = vpop.f32.mrf.mxu3 }
  0xd5   : > { %v476_v59 = vadd.f32 %v1324_v24, %v475_v55  ;;  %v496_v60 = vadd.f32 %v1324_v24, %v495_v56  ;;  %v438_v61 = vpop.f32.mrf.mxu0  ;;  %v458_v62 = vpop.f32.mrf.mxu1 }
  0xd6   : > { %v439_v5 = vadd.f32 %v1324_v24, %v438_v61  ;;  %v459_v6 = vadd.f32 %v1324_v24, %v458_v62 }
  0xd7   : > { %v861_v63 = vpack.c.bf16 %v476_v59, %v474_v57  ;;  %v881_v0 = vpack.c.bf16 %v496_v60, %v494_v58 }
  0xd9   : > { %901 = vst [vmem:[%s1332_s22 + $0x48] sm:$0xff] %v861_v63  }
  0xda   : > { %905 = vst [vmem:[%s1332_s22 + $0x68] sm:$0xff] %v881_v0  }
  0xdc   : > { %v478_v1 = vpop.f32.mrf.mxu2  ;;  %v498_v2 = vpop.f32.mrf.mxu3 }
  0xdd   : > { %v440_v3 = vpop.f32.mrf.mxu0  ;;  %v460_v4 = vpop.f32.mrf.mxu1  ;;  %v479_v13 = vadd.f32 %v1324_v24, %v478_v1  ;;  %v499_v14 = vadd.f32 %v1324_v24, %v498_v2 }
  0xde   : > { %v441_v7 = vadd.f32 %v1324_v24, %v440_v3  ;;  %v461_v8 = vadd.f32 %v1324_v24, %v460_v4 }
  0xe0   : > { %v826_v9 = vpack.c.bf16 %v441_v7, %v439_v5  ;;  %v846_v10 = vpack.c.bf16 %v461_v8, %v459_v6 }
  0xe2   : > { %894 = vst [vmem:[%s1332_s22 + $0x10] sm:$0xff] %v826_v9  }
  0xe3   : > { %898 = vst [vmem:[%s1332_s22 + $0x30] sm:$0xff] %v846_v10  }
  0xe4   : > { %v480_v11 = vpop.f32.mrf.mxu2  ;;  %v500_v12 = vpop.f32.mrf.mxu3 }
  0xe5   : > { %v481_v15 = vadd.f32 %v1324_v24, %v480_v11  ;;  %v501_v16 = vadd.f32 %v1324_v24, %v500_v12  ;;  %v443_v17 = vpop.f32.mrf.mxu0  ;;  %v463_v18 = vpop.f32.mrf.mxu1 }
  0xe6   : > { %v444_v26 = vadd.f32 %v1324_v24, %v443_v17  ;;  %v464_v27 = vadd.f32 %v1324_v24, %v463_v18 }
  0xe7   : > { %v866_v19 = vpack.c.bf16 %v481_v15, %v479_v13  ;;  %v886_v20 = vpack.c.bf16 %v501_v16, %v499_v14 }
  0xe9   : > { %902 = vst [vmem:[%s1332_s22 + $0x50] sm:$0xff] %v866_v19  }
  0xea   : > { %906 = vst [vmem:[%s1332_s22 + $0x70] sm:$0xff] %v886_v20  }
  0xec   : > { %v483_v21 = vpop.f32.mrf.mxu2  ;;  %v503_v22 = vpop.f32.mrf.mxu3 }
  0xed   : > { %v445_v23 = vpop.f32.mrf.mxu0  ;;  %v465_v25 = vpop.f32.mrf.mxu1  ;;  %v484_v34 = vadd.f32 %v1324_v24, %v483_v21  ;;  %v504_v35 = vadd.f32 %v1324_v24, %v503_v22 }
  0xee   : > { %v446_v28 = vadd.f32 %v1324_v24, %v445_v23  ;;  %v466_v29 = vadd.f32 %v1324_v24, %v465_v25 }
  0xf0   : > { %v831_v30 = vpack.c.bf16 %v446_v28, %v444_v26  ;;  %v851_v31 = vpack.c.bf16 %v466_v29, %v464_v27 }
  0xf2   : > { %895 = vst [vmem:[%s1332_s22 + $0x18] sm:$0xff] %v831_v30  }
  0xf3   : > { %899 = vst [vmem:[%s1332_s22 + $0x38] sm:$0xff] %v851_v31  }
  0xf4   : > { %v485_v32 = vpop.f32.mrf.mxu2  ;;  %v505_v33 = vpop.f32.mrf.mxu3 }
  0xf5   : > { %v486_v36 = vadd.f32 %v1324_v24, %v485_v32  ;;  %v506_v37 = vadd.f32 %v1324_v24, %v505_v33 }
  0xf7   : > { %v871_v38 = vpack.c.bf16 %v486_v36, %v484_v34  ;;  %v891_v39 = vpack.c.bf16 %v506_v37, %v504_v35 }
  0xf9   : > { %903 = vst [vmem:[%s1332_s22 + $0x58] sm:$0xff] %v871_v38  }
  0xfa   : > { %907 = vst [vmem:[%s1332_s22 + $0x78] sm:$0xff] %v891_v39  }
  0xfb   : > { %1082 = shalt.err (!%p1079_p0)
}
  0xfc   : > { %s1146_s6 = smov 64   ;;  %s1147_s7 = smov 4  }
  0xfd   : > { %923 = dma.vmem_to_hbm [thread:$0]  (%p1250_p5), %s589_s19, 2048, %s591_s24, %s573_s15, %s1146_s6, %s1146_s6, %s1147_s7  }
  0xfe PF: > { %s605_s1 = sand.u32 1, %s1121_s12   ;;  %p934_p3 = pnand %p692_p11, %p1217_p6 }
  0xff   : > { %s606_s20 = scalar_lea.sflag [#allocation4], %s605_s1 }
 0x100   : > { %p935_p7 = pneg %p934_p3 }
 0x102   : > { %1116 = dma.done.wait (%p935_p7), %s606_s20, 2048  }
 0x103   : > { %1118 = vsyncadd (%p935_p7), %s606_s20, 4294965248  ;;  %s20_s17 = sadd.s32 1, %s1141_s17   ;;  %s1432_s12 = smov %s1125_s13 }
 0x104   : > { %p17_p9 = scmp.ge.s32.totalorder %s20_s17, 4   ;;  %s1433_s13 = smov %s1129_s14 }
 0x105   : > { %s1434_s14 = smov %s1259_s18  ;;  %s1435_s15 = smov %s1137_s16 }
 0x106   : > { %s1436_s16 = smov %s1438_s5  ;;  %19 = sbr.rel (!%p17_p9) target bundleno = 9 (0x9), region = 81 }
 0x10b   :  { %612 = vsyncpa [#allocation3], 1 }
 0x10c   :  { %614 = vsyncpa [#allocation3 + $0x1], 1 }
 0x10d   :  { %615 = vsyncpa [#allocation6], 1 }
 0x10e   :  { %616 = vsyncpa [#allocation4], 1 }
 0x10f   :  { %618 = vsyncpa [#allocation4 + $0x1], 1 }

</bundles_post_ra>
